<compile_context>
chip_gen: v7x
topology: tpu7x:2x2x1
jax: 0.10.0
libtpu: 0.0.40
codegen_flags: <defaults>
</compile_context>

<pallas_src>
import functools

import jax
import jax.numpy as jnp
from jax.experimental import pallas as pl
from jax.experimental.pallas import tpu as pltpu


def _round_up(v, m):
    return ((v + m - 1) // m) * m


# ---------------------------------------------------------------------------
# Kernels
# ---------------------------------------------------------------------------
def _proj_kernel(x_ref, w_ref, o_ref):
    # XW row tile: [tk, Cin] @ [Cin, Hp] -> [tk, Hp]
    o_ref[...] = jnp.dot(
        x_ref[...], w_ref[...], preferred_element_type=jnp.float32
    ).astype(o_ref.dtype)


def _aggregate_kernel(a_ref, xw_ref, b_ref, alpha_ref, o_ref, acc_ref):
    # grid = (row tiles, K reduction tiles); output block is constant over k.
    k = pl.program_id(1)

    @pl.when(k == 0)
    def _():
        acc_ref[...] = jnp.zeros_like(acc_ref)

    acc_ref[...] += jnp.dot(
        a_ref[...], xw_ref[...], preferred_element_type=jnp.float32
    )

    @pl.when(k == pl.num_programs(1) - 1)
    def _():
        h = acc_ref[...] + b_ref[...]
        o_ref[...] = jnp.where(h > 0, h, alpha_ref[...] * h).astype(o_ref.dtype)


# ---------------------------------------------------------------------------
# Wrapper
# ---------------------------------------------------------------------------
@functools.partial(jax.jit, static_argnames=("block_m", "block_k"))
def encoder_forward(a_norm, x, w, b, alpha, *, block_m=128, block_k=128):
    """y = PReLU(A_norm @ (X @ W) + b) with dense A_norm [N, N]."""
    n, c_in = x.shape
    h = w.shape[1]
    compute_dtype = jnp.bfloat16

    # lane-dense output width (multiple of 128); padded cols sliced off below.
    hp = _round_up(max(h, 128), 128)

    # tile sizes: multiples of 8, or the whole (padded) N when N is small.
    tm = block_m if n > block_m else _round_up(n, 8)
    tk = block_k if n > block_k else _round_up(n, 8)
    n_pad_m = _round_up(n, tm)
    n_pad_k = _round_up(n, tk)

    # zero padding is exact for the matmul; padded rows/cols are sliced off.
    a_p = jnp.zeros((n_pad_m, n_pad_k), compute_dtype)
    a_p = a_p.at[:n, :n].set(a_norm.astype(compute_dtype))
    x_p = jnp.zeros((n_pad_k, c_in), jnp.float32).at[:n, :].set(x)
    w_p = jnp.zeros((c_in, hp), jnp.float32).at[:, :h].set(w.reshape(c_in, h))
    b_p = jnp.zeros((1, hp), jnp.float32).at[:, :h].set(b.reshape(1, h))
    al_p = jnp.zeros((1, hp), jnp.float32).at[:, :h].set(alpha.reshape(1, h))

    # ---- XW = X @ W (hoisted out of the adjacency reduction) ---------------
    xw = pl.pallas_call(
        _proj_kernel,
        out_shape=jax.ShapeDtypeStruct((n_pad_k, hp), compute_dtype),
        grid=(n_pad_k // tk,),
        in_specs=[
            pl.BlockSpec((tk, c_in), lambda i: (i, 0)),
            pl.BlockSpec((c_in, hp), lambda i: (0, 0)),
        ],
        out_specs=pl.BlockSpec((tk, hp), lambda i: (i, 0)),
        compiler_params=pltpu.CompilerParams(dimension_semantics=("parallel",)),
    )(x_p, w_p)

    # ---- y = PReLU(A_norm @ XW + b), tiled with a K-reduction axis ---------
    itemsize = jnp.dtype(compute_dtype).itemsize
    cost = pl.CostEstimate(
        flops=2 * n_pad_m * n_pad_k * hp,
        transcendentals=0,
        bytes_accessed=(n_pad_m * n_pad_k + n_pad_k * hp) * itemsize
        + n_pad_m * hp * 4,
    )
    out_p = pl.pallas_call(
        _aggregate_kernel,
        out_shape=jax.ShapeDtypeStruct((n_pad_m, hp), jnp.float32),
        grid=(n_pad_m // tm, n_pad_k // tk),
        in_specs=[
            pl.BlockSpec((tm, tk), lambda i, k: (i, k)),   # A row/K tile (bf16)
            pl.BlockSpec((tk, hp), lambda i, k: (k, 0)),   # XW K tile (bf16)
            pl.BlockSpec((1, hp), lambda i, k: (0, 0)),    # bias (resident)
            pl.BlockSpec((1, hp), lambda i, k: (0, 0)),    # alpha (resident)
        ],
        out_specs=pl.BlockSpec((tm, hp), lambda i, k: (i, 0)),
        scratch_shapes=[pltpu.VMEM((tm, hp), jnp.float32)],
        compiler_params=pltpu.CompilerParams(
            dimension_semantics=("parallel", "arbitrary")
        ),
        cost_estimate=cost,
    )(a_p, xw, b_p, al_p)

    return out_p[:n, :h]


# ---------------------------------------------------------------------------
# Graph normalization glue (plain JAX)
# ---------------------------------------------------------------------------
def gcn_normalized_adjacency(edge_index, num_nodes):
    """Dense \\hat{A} = D^{-1/2} (A + I) D^{-1/2}, matching PyG GCNConv defaults."""
    # TODO(synk): for real sparse graphs, replace this dense N x N stream with a
    # block-sparse gather driven by PrefetchScalarGridSpec neighbor tables.
    src = edge_index[0]
    dst = edge_index[1]
    loops = jnp.arange(num_nodes, dtype=src.dtype)
    src = jnp.concatenate([src, loops])
    dst = jnp.concatenate([dst, loops])
    ew = jnp.ones(src.shape[0], dtype=jnp.float32)
    deg = jnp.zeros((num_nodes,), jnp.float32).at[dst].add(ew)
    dinv = jnp.where(deg > 0, 1.0 / jnp.sqrt(deg), 0.0)
    norm = dinv[src] * ew * dinv[dst]
    # message flows src -> dst : out[i] = sum_j A[i, j] x[j]  with A[dst, src] = norm
    a = jnp.zeros((num_nodes, num_nodes), jnp.float32).at[dst, src].add(norm)
    return a


if __name__ == "__main__":
    key = jax.random.PRNGKey(0)
    k_x, k_e, k_w = jax.random.split(key, 3)

    num_nodes = 256          # small, but larger than one tile so the grid tiles
    in_channels = 8
    hidden_channels = 32
    num_edges = 1024

    # node features [N, C_in]
    x = jax.random.normal(k_x, (num_nodes, in_channels), jnp.float32)

    # random edge_index [2, E]
    edge_index = jax.random.randint(k_e, (2, num_edges), 0, num_nodes, jnp.int32)

    # deterministic parameter init (synthetic, not a checkpoint load)
    w = (jax.random.normal(k_w, (in_channels, hidden_channels), jnp.float32)
         * (1.0 / jnp.sqrt(in_channels)))
    b = jnp.zeros((hidden_channels,), jnp.float32)
    alpha = jnp.full((hidden_channels,), 0.25, jnp.float32)  # PReLU init

    a_norm = gcn_normalized_adjacency(edge_index, num_nodes)

    out = encoder_forward(a_norm, x, w, b, alpha)
    jax.block_until_ready(out)

    # pure-JAX f32 reference (kernel streams bf16 operands with f32 accumulation,
    # hence the relaxed tolerance).
    ref_h = a_norm @ (x @ w) + b.reshape(1, -1)
    ref = jnp.where(ref_h > 0, ref_h, alpha.reshape(1, -1) * ref_h)
    assert out.shape == ref.shape
    assert jnp.allclose(out, ref, atol=2e-2, rtol=5e-2), (
        "max abs err = %f" % float(jnp.max(jnp.abs(out - ref))))

    print("KERNEL_OK")
</pallas_src>

<mosaic_0001>
module attributes {stable_mosaic.version = 11 : i64} {
  func.func @_proj_kernel(%arg0: i32, %arg1: memref<128x8xf32, #tpu.memory_space<vmem>>, %arg2: memref<8x128xf32, #tpu.memory_space<vmem>>, %arg3: memref<128x128xbf16, #tpu.memory_space<vmem>>) attributes {dimension_semantics = [#tpu.dimension_semantics<parallel>], iteration_bounds = array<i64: 2>, scalar_prefetch = 0 : i64, scratch_operands = 0 : i64, tpu.core_type = #tpu.core_type<tc>, window_params = [{transform_indices = @transform_0, window_bounds = array<i64: 128, 8>}, {pipeline_mode = #tpu.pipeline_mode<synchronous>, transform_indices = @transform_1, window_bounds = array<i64: 8, 128>}, {transform_indices = @transform_2, window_bounds = array<i64: 128, 128>}]} {
    %c0 = arith.constant 0 : index
    %c0_0 = arith.constant 0 : index
    %0 = vector.load %arg1[%c0, %c0_0] : memref<128x8xf32, #tpu.memory_space<vmem>>, vector<128x8xf32>
    %c0_1 = arith.constant 0 : index
    %c0_2 = arith.constant 0 : index
    %1 = vector.load %arg2[%c0_1, %c0_2] : memref<8x128xf32, #tpu.memory_space<vmem>>, vector<8x128xf32>
    %cst = arith.constant dense<0.000000e+00> : vector<128x128xf32>
    %2 = tpu.matmul %0, %1, %cst {dimension_numbers = #tpu.dot_dimension_numbers<[1], [0], [0], [1], [0, 0, 1, 1], [], []>} : vector<128x8xf32>, vector<8x128xf32>, vector<128x128xf32> -> vector<128x128xf32>
    %3 = arith.truncf %2 : vector<128x128xf32> to vector<128x128xbf16>
    %c0_3 = arith.constant 0 : index
    %c0_4 = arith.constant 0 : index
    %4 = vector.load %arg3[%c0_3, %c0_4] : memref<128x128xbf16, #tpu.memory_space<vmem>>, vector<128x128xbf16>
    tpu.vector_store %arg3[%c0_3, %c0_4], %3 {strides = array<i32>} : memref<128x128xbf16, #tpu.memory_space<vmem>>, vector<128x128xbf16>,
    return
  }
  func.func @transform_0(%arg0: i32) -> (i32, i32) {
    %c0_i32 = arith.constant 0 : i32
    %c0_i32_0 = arith.constant 0 : i32
    return %arg0, %c0_i32 : i32, i32
  }
  func.func @transform_1(%arg0: i32) -> (i32, i32) {
    %c0_i32 = arith.constant 0 : i32
    %c0_i32_0 = arith.constant 0 : i32
    %c0_i32_1 = arith.constant 0 : i32
    return %c0_i32, %c0_i32_0 : i32, i32
  }
  func.func @transform_2(%arg0: i32) -> (i32, i32) {
    %c0_i32 = arith.constant 0 : i32
    %c0_i32_0 = arith.constant 0 : i32
    return %arg0, %c0_i32 : i32, i32
  }
}

module attributes {stable_mosaic.version = 11 : i64} {
  func.func @_aggregate_kernel(%arg0: i32, %arg1: i32, %arg2: memref<128x128xbf16, #tpu.memory_space<vmem>>, %arg3: memref<128x128xbf16, #tpu.memory_space<vmem>>, %arg4: memref<1x128xf32, #tpu.memory_space<vmem>>, %arg5: memref<1x128xf32, #tpu.memory_space<vmem>>, %arg6: memref<128x128xf32, #tpu.memory_space<vmem>>, %arg7: memref<128x128xf32, #tpu.memory_space<vmem>>) attributes {dimension_semantics = [#tpu.dimension_semantics<parallel>, #tpu.dimension_semantics<arbitrary>], iteration_bounds = array<i64: 2, 2>, scalar_prefetch = 0 : i64, scratch_operands = 1 : i64, tpu.core_type = #tpu.core_type<tc>, window_params = [{transform_indices = @transform_0, window_bounds = array<i64: 128, 128>}, {transform_indices = @transform_1, window_bounds = array<i64: 128, 128>}, {pipeline_mode = #tpu.pipeline_mode<synchronous>, transform_indices = @transform_2, window_bounds = array<i64: 1, 128>}, {pipeline_mode = #tpu.pipeline_mode<synchronous>, transform_indices = @transform_3, window_bounds = array<i64: 1, 128>}, {transform_indices = @transform_4, window_bounds = array<i64: 128, 128>}]} {
    %c0_i32 = arith.constant 0 : i32
    %0 = arith.cmpi eq, %arg1, %c0_i32 : i32
    %1 = arith.extui %0 : i1 to i32
    %c0_i32_0 = arith.constant 0 : i32
    %2 = arith.cmpi ne, %1, %c0_i32_0 : i32
    scf.if %2 {
      %cst_9 = arith.constant 0.000000e+00 : f32
      %12 = vector.broadcast %cst_9 : f32 to vector<128x128xf32>
      %c0_10 = arith.constant 0 : index
      %c0_11 = arith.constant 0 : index
      %13 = vector.load %arg7[%c0_10, %c0_11] : memref<128x128xf32, #tpu.memory_space<vmem>>, vector<128x128xf32>
      tpu.vector_store %arg7[%c0_10, %c0_11], %12 {strides = array<i32>} : memref<128x128xf32, #tpu.memory_space<vmem>>, vector<128x128xf32>,
    } else {
    }
    %c0 = arith.constant 0 : index
    %c0_1 = arith.constant 0 : index
    %3 = vector.load %arg7[%c0, %c0_1] : memref<128x128xf32, #tpu.memory_space<vmem>>, vector<128x128xf32>
    %c0_2 = arith.constant 0 : index
    %c0_3 = arith.constant 0 : index
    %4 = vector.load %arg2[%c0_2, %c0_3] : memref<128x128xbf16, #tpu.memory_space<vmem>>, vector<128x128xbf16>
    %c0_4 = arith.constant 0 : index
    %c0_5 = arith.constant 0 : index
    %5 = vector.load %arg3[%c0_4, %c0_5] : memref<128x128xbf16, #tpu.memory_space<vmem>>, vector<128x128xbf16>
    %cst = arith.constant dense<0.000000e+00> : vector<128x128xf32>
    %6 = tpu.matmul %4, %5, %cst {dimension_numbers = #tpu.dot_dimension_numbers<[1], [0], [0], [1], [0, 0, 1, 1], [], []>} : vector<128x128xbf16>, vector<128x128xbf16>, vector<128x128xf32> -> vector<128x128xf32>
    %7 = arith.addf %3, %6 : vector<128x128xf32>
    %c0_6 = arith.constant 0 : index
    %c0_7 = arith.constant 0 : index
    %8 = vector.load %arg7[%c0_6, %c0_7] : memref<128x128xf32, #tpu.memory_space<vmem>>, vector<128x128xf32>
    tpu.vector_store %arg7[%c0_6, %c0_7], %7 {strides = array<i32>} : memref<128x128xf32, #tpu.memory_space<vmem>>, vector<128x128xf32>,
    %c1_i32 = arith.constant 1 : i32
    %9 = arith.cmpi eq, %arg1, %c1_i32 : i32
    %10 = arith.extui %9 : i1 to i32
    %c0_i32_8 = arith.constant 0 : i32
    %11 = arith.cmpi ne, %10, %c0_i32_8 : i32
    scf.if %11 {
      %c0_9 = arith.constant 0 : index
      %c0_10 = arith.constant 0 : index
      %12 = vector.load %arg7[%c0_9, %c0_10] : memref<128x128xf32, #tpu.memory_space<vmem>>, vector<128x128xf32>
      %c0_11 = arith.constant 0 : index
      %c0_12 = arith.constant 0 : index
      %13 = vector.load %arg4[%c0_11, %c0_12] : memref<1x128xf32, #tpu.memory_space<vmem>>, vector<1x128xf32>
      %14 = vector.broadcast %13 : vector<1x128xf32> to vector<128x128xf32>
      %15 = arith.addf %12, %14 : vector<128x128xf32>
      %cst_13 = arith.constant 0.000000e+00 : f32
      %16 = vector.broadcast %cst_13 : f32 to vector<128x128xf32>
      %17 = arith.cmpf ogt, %15, %16 : vector<128x128xf32>
      %c0_14 = arith.constant 0 : index
      %c0_15 = arith.constant 0 : index
      %18 = vector.load %arg5[%c0_14, %c0_15] : memref<1x128xf32, #tpu.memory_space<vmem>>, vector<1x128xf32>
      %19 = vector.broadcast %18 : vector<1x128xf32> to vector<128x128xf32>
      %20 = arith.mulf %19, %15 : vector<128x128xf32>
      %21 = arith.select %17, %15, %20 : vector<128x128xi1>, vector<128x128xf32>
      %c0_16 = arith.constant 0 : index
      %c0_17 = arith.constant 0 : index
      %22 = vector.load %arg6[%c0_16, %c0_17] : memref<128x128xf32, #tpu.memory_space<vmem>>, vector<128x128xf32>
      tpu.vector_store %arg6[%c0_16, %c0_17], %21 {strides = array<i32>} : memref<128x128xf32, #tpu.memory_space<vmem>>, vector<128x128xf32>,
    } else {
    }
    return
  }
  func.func @transform_0(%arg0: i32, %arg1: i32) -> (i32, i32) {
    %c0_i32 = arith.constant 0 : i32
    return %arg0, %arg1 : i32, i32
  }
  func.func @transform_1(%arg0: i32, %arg1: i32) -> (i32, i32) {
    %c0_i32 = arith.constant 0 : i32
    %c0_i32_0 = arith.constant 0 : i32
    return %arg1, %c0_i32 : i32, i32
  }
  func.func @transform_2(%arg0: i32, %arg1: i32) -> (i32, i32) {
    %c0_i32 = arith.constant 0 : i32
    %c0_i32_0 = arith.constant 0 : i32
    %c0_i32_1 = arith.constant 0 : i32
    return %c0_i32, %c0_i32_0 : i32, i32
  }
  func.func @transform_3(%arg0: i32, %arg1: i32) -> (i32, i32) {
    %c0_i32 = arith.constant 0 : i32
    %c0_i32_0 = arith.constant 0 : i32
    %c0_i32_1 = arith.constant 0 : i32
    return %c0_i32, %c0_i32_0 : i32, i32
  }
  func.func @transform_4(%arg0: i32, %arg1: i32) -> (i32, i32) {
    %c0_i32 = arith.constant 0 : i32
    %c0_i32_0 = arith.constant 0 : i32
    return %arg0, %c0_i32 : i32, i32
  }
}

</mosaic_0001>

<bundles_post_ra>
// kernel: encoder_forward.2
= control target key start
LH: loop header
LB: loop body
LE: loop exit
PB: predicated region body
PF: predicated region fallthrough
CT: control target
= control target key end

     0   :  { %s676_s9 = smov 0   ;;  %s716_s0 = inlined_call_operand.vmem [shape: f32[256,8], index: 0, kind: input, shape index: {}]   ;;  %s717_s1 = inlined_call_operand.vmem [shape: f32[8,128], index: 1, kind: input, shape index: {}]   ;;  %s718_s2 = inlined_call_operand.vmem [shape: bf16[256,128], index: 2, kind: output, shape index: {}]  }
   0x1 LB: > { %s494_s10 = sadd.s32 4294967295, %s659_s9   ;;  %p498_p0 = scmp.ge.s32.totalorder %s659_s9, 1  ;;  %s659_s9 = sphi %s676_s9, %s12_s9  }
   0x2   : > { %p113_p1 = scmp.lt.s32.totalorder %s659_s9, 3 }
   0x4   : > { %p114_p2 = pnand %p498_p0, %p113_p1 }
   0x5   : > { %v163_v0 = vld [vmem:[%s717_s1] sm:$0xff] (!%p114_p2)  ;;  %s499_s13 = sshll.u32 (!%p114_p2), %s494_s10, 4  ;;  %vm164_vm0 = vcmask (!%p114_p2), 64512  }
   0x6   : > { %117 = sbr.rel (%p114_p2) target bundleno = 247 (0xf7), region = 28  ;;  %617 = vmatprep.subr.mxu0 (!%p114_p2), %v163_v0  ;;  %643 = vmatprep.subr.mxu1 (!%p114_p2), %v163_v0  ;;  %p136_p3 = scmp.lt.s32.totalorder (!%p114_p2), %s499_s13, 31 }
   0x7   : > { %618 = vmatpush3.msra.mxu0 (!%p114_p2), %v163_v0  ;;  %644 = vmatpush3.msra.mxu1 (!%p114_p2), %v163_v0 }
   0xd   : > { %s720_s13 = smov (!%p136_p3, %s499_s13), 31 }
   0xe   : > { %s500_s14 = sshll.u32 %s720_s13, 3  ;;  %s502_s18 = sshll.u32 %s720_s13, 2 }
   0xf   : > { %s139_s17 = scalar_lea.vmem %s716_s0, %s500_s14  ;;  %s145_s21 = scalar_lea.vmem %s718_s2, %s502_s18 }
  0x10   : > { %v147_v1 = vld [vmem:[%s139_s17] sm:$0xff]  ;;  %v148_v3 = vld [vmem:[%s139_s17 + $0x8] sm:$0xff]  ;;  %v149_v5 = vld [vmem:[%s139_s17 + $0x10] sm:$0xff] }
  0x11   : > { %v155_v2 = vld [vmem:[%s139_s17 + $0x40] sm:$0xff]  ;;  %619 = vmatprep.mubr.msk.f32.mxu0 %vm164_vm0, %v147_v1  ;;  %v156_v4 = vld [vmem:[%s139_s17 + $0x48] sm:$0xff]  ;;  %v157_v6 = vld [vmem:[%s139_s17 + $0x50] sm:$0xff] }
  0x12   : > { %631 = vmatprep.mubr.msk.f32.mxu1 %vm164_vm0, %v155_v2  ;;  %620 = vmatmul.mubr.msk.f32.vlgmr.msra.gmra.mrb[0].mxu0 %vm164_vm0, %v148_v3  ;;  %v150_v7 = vld [vmem:[%s139_s17 + $0x18] sm:$0xff]  ;;  %v151_v9 = vld [vmem:[%s139_s17 + $0x20] sm:$0xff]  ;;  %v152_v11 = vld [vmem:[%s139_s17 + $0x28] sm:$0xff] }
  0x13   : > { %632 = vmatmul.mubr.msk.f32.vlgmr.msra.gmra.mrb[0].mxu1 %vm164_vm0, %v156_v4  ;;  %622 = vmatprep.mubr.msk.f32.mxu0 %vm164_vm0, %v149_v5  ;;  %v158_v8 = vld [vmem:[%s139_s17 + $0x58] sm:$0xff]  ;;  %v159_v10 = vld [vmem:[%s139_s17 + $0x60] sm:$0xff]  ;;  %v160_v12 = vld [vmem:[%s139_s17 + $0x68] sm:$0xff] }
  0x14   : > { %634 = vmatprep.mubr.msk.f32.mxu1 %vm164_vm0, %v157_v6  ;;  %v153_v13 = vld [vmem:[%s139_s17 + $0x30] sm:$0xff]  ;;  %v154_v15 = vld [vmem:[%s139_s17 + $0x38] sm:$0xff] }
  0x15   : > { %v161_v14 = vld [vmem:[%s139_s17 + $0x70] sm:$0xff]  ;;  %v162_v16 = vld [vmem:[%s139_s17 + $0x78] sm:$0xff] }
  0x16   : > { %623 = vmatmul.mubr.msk.f32.gmra.mrb[2].mxu0 %vm164_vm0, %v150_v7 }
  0x17   : > { %635 = vmatmul.mubr.msk.f32.gmra.mrb[2].mxu1 %vm164_vm0, %v158_v8  ;;  %625 = vmatprep.mubr.msk.f32.mxu0 %vm164_vm0, %v151_v9 }
  0x18   : > { %637 = vmatprep.mubr.msk.f32.mxu1 %vm164_vm0, %v159_v10 }
  0x1a   : > { %626 = vmatmul.mubr.msk.f32.gmra.mrb[4].mxu0 %vm164_vm0, %v152_v11 }
  0x1b   : > { %638 = vmatmul.mubr.msk.f32.gmra.mrb[4].mxu1 %vm164_vm0, %v160_v12  ;;  %628 = vmatprep.mubr.msk.f32.mxu0 %vm164_vm0, %v153_v13 }
  0x1c   : > { %640 = vmatprep.mubr.msk.f32.mxu1 %vm164_vm0, %v161_v14 }
  0x1e   : > { %629 = vmatmul.mubr.msk.f32.gmra.mrb[6].mxu0 %vm164_vm0, %v154_v15 }
  0x1f   : > { %641 = vmatmul.mubr.msk.f32.gmra.mrb[6].mxu1 %vm164_vm0, %v162_v16 }
  0xe5   : > { %v621_v17 = vpop.f32.mrb[0].mxu0 }
  0xe6   : > { %v633_v18 = vpop.f32.mrb[0].mxu1  ;;  %v279_v19 = vpop.f32.mrb[1].mxu0 }
  0xe7   : > { %v319_v20 = vpop.f32.mrb[1].mxu1  ;;  %v556_v21 = vpack.c.bf16 %v621_v17, %v279_v19 }
  0xe8   : > { %v576_v22 = vpack.c.bf16 %v633_v18, %v319_v20 }
  0xe9   : > { %557 = vst [vmem:[%s145_s21] sm:$0xff] %v556_v21   ;;  %v624_v23 = vpop.f32.mrb[2].mxu0 }
  0xea   : > { %596 = vst [vmem:[%s145_s21 + $0x20] sm:$0xff] %v576_v22   ;;  %v636_v24 = vpop.f32.mrb[2].mxu1  ;;  %v289_v25 = vpop.f32.mrb[3].mxu0 }
  0xeb   : > { %v329_v26 = vpop.f32.mrb[3].mxu1  ;;  %v561_v27 = vpack.c.bf16 %v624_v23, %v289_v25 }
  0xec   : > { %v581_v28 = vpack.c.bf16 %v636_v24, %v329_v26 }
  0xed   : > { %593 = vst [vmem:[%s145_s21 + $0x8] sm:$0xff] %v561_v27   ;;  %v627_v29 = vpop.f32.mrb[4].mxu0 }
  0xee   : > { %597 = vst [vmem:[%s145_s21 + $0x28] sm:$0xff] %v581_v28   ;;  %v639_v30 = vpop.f32.mrb[4].mxu1  ;;  %v299_v31 = vpop.f32.mrb[5].mxu0 }
  0xef   : > { %v339_v32 = vpop.f32.mrb[5].mxu1  ;;  %v566_v33 = vpack.c.bf16 %v627_v29, %v299_v31 }
  0xf0   : > { %v586_v34 = vpack.c.bf16 %v639_v30, %v339_v32 }
  0xf1   : > { %594 = vst [vmem:[%s145_s21 + $0x10] sm:$0xff] %v566_v33   ;;  %v630_v35 = vpop.f32.mrb[6].mxu0 }
  0xf2   : > { %598 = vst [vmem:[%s145_s21 + $0x30] sm:$0xff] %v586_v34   ;;  %v642_v36 = vpop.f32.mrb[6].mxu1  ;;  %v309_v37 = vpop.f32.mrb[7].mxu0 }
  0xf3   : > { %v349_v38 = vpop.f32.mrb[7].mxu1  ;;  %v571_v39 = vpack.c.bf16 %v630_v35, %v309_v37 }
  0xf4   : > { %v591_v40 = vpack.c.bf16 %v642_v36, %v349_v38 }
  0xf5   : > { %595 = vst [vmem:[%s145_s21 + $0x18] sm:$0xff] %v571_v39  }
  0xf6   : > { %599 = vst [vmem:[%s145_s21 + $0x38] sm:$0xff] %v591_v40  }
  0xf7 PF: > { %s12_s9 = sadd.s32 1, %s659_s9  }
  0xf8   : > { %p9_p4 = scmp.ge.s32.totalorder %s12_s9, 4  }
  0xfa   :  { %11 = sbr.rel (!%p9_p4) target bundleno = 1 (0x1), region = 58 }

// kernel: encoder_forward.3
= control target key start
LH: loop header
LB: loop body
LE: loop exit
PB: predicated region body
PF: predicated region fallthrough
CT: control target
= control target key end

     0   :  { %s1092_s15 = smov 0   ;;  %s1094_s16 = smov 0   ;;  %s1285_s0 = inlined_call_operand.vmem [shape: bf16[256,256], index: 0, kind: input, shape index: {}]   ;;  %s1286_s1 = inlined_call_operand.vmem [shape: bf16[256,128], index: 1, kind: input, shape index: {}]   ;;  %s1287_s2 = inlined_call_operand.vmem [shape: f32[1,128], index: 2, kind: input, shape index: {}]   ;;  %s1288_s3 = inlined_call_operand.vmem [shape: f32[1,128], index: 3, kind: input, shape index: {}]   ;;  %s1289_s4 = inlined_call_operand.vmem [shape: f32[256,128], index: 4, kind: output, shape index: {}]  }
   0x1   :  { %s1096_s17 = smov 0   ;;  %s1098_s18 = smov 0  }
   0x2   :  { %s1100_s19 = smov 0   ;;  %s1102_s20 = smov 0  }
   0x3   :  { %s1104_s21 = smov 0  }
   0x4 LB: > { %s23_s22 = sadd.s32 1, %s1056_s19  ;;  %s26_s23 = sadd.s32 1, %s1060_s20  ;;  %s1064_s21 = sphi %s1104_s21, %s14_s21   ;;  %s1060_s20 = sphi %s1102_s20, %s1295_s20   ;;  %s1056_s19 = sphi %s1100_s19, %s1294_s19   ;;  %s1052_s18 = sphi %s1098_s18, %s1293_s18   ;;  %s1048_s17 = sphi %s1096_s17, %s1292_s17   ;;  %s1044_s16 = sphi %s1094_s16, %s1291_s16   ;;  %s1040_s15 = sphi %s1092_s15, %s1290_s15  }
   0x5   : > { %p24_p0 = scmp.ge.s32.totalorder %s23_s22, 2  ;;  %p42_p1 = scmp.ne.s32.totalorder %s1044_s16, %s1040_s15 }
   0x6   : > { %p43_p2 = scmp.eq.s32.totalorder %s1064_s21, 0  ;;  %s35_s27 = sadd.s32 1, %s1044_s16 }
   0x7   : > { %s1297_s22 = smov (%p24_p0, %s23_s22), 0  ;;  %s1299_s23 = smov (!%p24_p0, %s26_s23), %s1060_s20 }
   0x8   : > { %p44_p3 = por %p43_p2, %p42_p1  ;;  %p28_p4 = scmp.ge.s32.totalorder %s1299_s23, 2 }
   0x9   : > { %s31_s24 = ssub.s32 %s1056_s19, %s1297_s22  ;;  %p839_p6 = scmp.ge.s32.totalorder %s1064_s21, 4 }
   0xa   : > { %s1301_s23 = smov (%p28_p4, %s1299_s23), 0 }
   0xb   : > { %s30_s25 = ssub.s32 %s1060_s20, %s1301_s23  ;;  %168 = sbr.rel (%p839_p6) target bundleno = 34 (0x22), region = 24 }
   0xc   : > { %s32_s26 = sor.u32 %s31_s24, %s30_s25 }
   0xd   : > { %p33_p5 = scmp.eq.s32.totalorder %s32_s26, 0 }
   0xf   : > { %s1143_s28 = scalar_select %p33_p5, %s1044_s16, %s35_s27  }
  0x12   : > { %171 = sbr.rel (!%p44_p3) target bundleno = 34 (0x22), region = 28  ;;  %s173_s29 = sand.u32 (%p44_p3), 1, %s1044_s16  }
  0x13   : > { %s872_s30 = sshll.u32 (%p44_p3), %s1060_s20, 5  ;;  %s840_s5 = sshll.u32 (%p44_p3), %s173_s29, 6 }
  0x14   : > { %s178_s6 = sadd.s32 (%p44_p3), %s1056_s19, %s872_s30  ;;  %s175_s11 = scalar_lea.vmem (%p44_p3), [#allocation3], %s840_s5 }
  0x15   : > { %s843_s7 = sshll.u32 (%p44_p3), %s178_s6, 2 }
  0x16   : > { %s1152_s10 = scalar_lea.vmem (%p44_p3), %s1285_s0, %s843_s7 }
  0x17   : > { %v196_v0 = vld [vmem:[%s1152_s10] sm:$0xf] (%p44_p3)  ;;  %v198_v1 = vld [vmem:[%s1152_s10 + $0x8] sm:$0xf] (%p44_p3)  ;;  %v200_v2 = vld [vmem:[%s1152_s10 + $0x10] sm:$0xf] (%p44_p3) }
  0x18   : > { %197 = vst [vmem:[%s175_s11] sm:$0xf] (%p44_p3), %v196_v0  ;;  %199 = vst [vmem:[%s175_s11 + $0x4] sm:$0xf] (%p44_p3), %v198_v1  ;;  %v202_v3 = vld [vmem:[%s1152_s10 + $0x18] sm:$0xf] (%p44_p3) }
  0x19   : > { %201 = vst [vmem:[%s175_s11 + $0x8] sm:$0xf] %v200_v2  ;;  %v204_v4 = vld [vmem:[%s1152_s10 + $0x20] sm:$0xf]  ;;  %v206_v5 = vld [vmem:[%s1152_s10 + $0x28] sm:$0xf] }
  0x1a   : > { %203 = vst [vmem:[%s175_s11 + $0xc] sm:$0xf] %v202_v3  ;;  %205 = vst [vmem:[%s175_s11 + $0x10] sm:$0xf] %v204_v4  ;;  %v208_v6 = vld [vmem:[%s1152_s10 + $0x30] sm:$0xf] }
  0x1b   : > { %207 = vst [vmem:[%s175_s11 + $0x14] sm:$0xf] %v206_v5  ;;  %v210_v7 = vld [vmem:[%s1152_s10 + $0x38] sm:$0xf]  ;;  %v212_v8 = vld [vmem:[%s1152_s10 + $0x40] sm:$0xf] }
  0x1c   : > { %209 = vst [vmem:[%s175_s11 + $0x18] sm:$0xf] %v208_v6  ;;  %211 = vst [vmem:[%s175_s11 + $0x1c] sm:$0xf] %v210_v7  ;;  %v214_v9 = vld [vmem:[%s1152_s10 + $0x48] sm:$0xf] }
  0x1d   : > { %213 = vst [vmem:[%s175_s11 + $0x20] sm:$0xf] %v212_v8  ;;  %v216_v10 = vld [vmem:[%s1152_s10 + $0x50] sm:$0xf]  ;;  %v218_v11 = vld [vmem:[%s1152_s10 + $0x58] sm:$0xf] }
  0x1e   : > { %215 = vst [vmem:[%s175_s11 + $0x24] sm:$0xf] %v214_v9  ;;  %217 = vst [vmem:[%s175_s11 + $0x28] sm:$0xf] %v216_v10  ;;  %v220_v12 = vld [vmem:[%s1152_s10 + $0x60] sm:$0xf] }
  0x1f   : > { %219 = vst [vmem:[%s175_s11 + $0x2c] sm:$0xf] %v218_v11  ;;  %v222_v13 = vld [vmem:[%s1152_s10 + $0x68] sm:$0xf]  ;;  %v224_v14 = vld [vmem:[%s1152_s10 + $0x70] sm:$0xf] }
  0x20   : > { %221 = vst [vmem:[%s175_s11 + $0x30] sm:$0xf] %v220_v12  ;;  %223 = vst [vmem:[%s175_s11 + $0x34] sm:$0xf] %v222_v13  ;;  %v226_v15 = vld [vmem:[%s1152_s10 + $0x78] sm:$0xf] }
  0x21   : > { %225 = vst [vmem:[%s175_s11 + $0x38] sm:$0xf] %v224_v14  ;;  %227 = vst [vmem:[%s175_s11 + $0x3c] sm:$0xf] %v226_v15 }
  0x22 PF: > { %p844_p7 = scmp.ge.s32.totalorder %s1064_s21, 1  ;;  %p290_p8 = scmp.lt.s32.totalorder %s1064_s21, 5 }
  0x24   : > { %p291_p9 = pnand %p844_p7, %p290_p8 }
  0x25   : > { %s297_s12 = sand.u32 (!%p291_p9), 1, %s1040_s15   ;;  %s846_s13 = sshll.u32 (!%p291_p9), %s1048_s17, 4 }
  0x26   : > { %294 = sbr.rel (%p291_p9) target bundleno = 332 (0x14c), region = 73  ;;  %s845_s14 = sshll.u32 (!%p291_p9), %s297_s12, 6 }
  0x27   : > { %p329_p10 = scmp.lt.s32.totalorder (!%p291_p9), %s846_s13, 31  ;;  %s848_s24 = sshll.u32 (!%p291_p9), %s1052_s18, 4 }
  0x28   : > { %p335_p11 = scmp.lt.s32.totalorder (!%p291_p9), %s848_s24, 31  ;;  %s1185_s15 = scalar_lea.vmem (!%p291_p9), [#allocation3], %s845_s14 }
  0x29   : > { %p850_p12 = scmp.ne.s32.totalorder (!%p291_p9), %s1048_s17, 0 }
  0x2d   : > { %s1303_s13 = smov (!%p329_p10, %s846_s13), 31  ;;  %s1305_s24 = smov (!%p335_p11, %s848_s24), 31 }
  0x2e   : > { %s847_s25 = sshll.u32 %s1303_s13, 2  ;;  %s849_s30 = sshll.u32 %s1305_s24, 3  ;;  %v1066_v16 = vmov (!%p850_p12), 0.0  }
  0x2f   : > { %s1178_s29 = scalar_lea.vmem %s1286_s1, %s847_s25  ;;  %s1183_s7 = scalar_lea.vmem %s1289_s4, %s849_s30  ;;  %345 = vst [vmem:[#allocation2] sm:$0xff] (!%p850_p12), %v1066_v16  ;;  %346 = vst [vmem:[#allocation2 + $0x8] sm:$0xff] (!%p850_p12), %v1066_v16 }
  0x30   : > { %344 = sbr.rel (%p850_p12) target bundleno = 55 (0x37), region = 81  ;;  %347 = vst [vmem:[#allocation2 + $0x10] sm:$0xff] (!%p850_p12), %v1066_v16  ;;  %348 = vst [vmem:[#allocation2 + $0x18] sm:$0xff] (!%p850_p12), %v1066_v16 }
  0x31   : > { %349 = vst [vmem:[#allocation2 + $0x20] sm:$0xff] (!%p850_p12), %v1066_v16  ;;  %350 = vst [vmem:[#allocation2 + $0x28] sm:$0xff] (!%p850_p12), %v1066_v16 }
  0x32   : > { %351 = vst [vmem:[#allocation2 + $0x30] sm:$0xff] (!%p850_p12), %v1066_v16  ;;  %352 = vst [vmem:[#allocation2 + $0x38] sm:$0xff] (!%p850_p12), %v1066_v16 }
  0x33   : > { %353 = vst [vmem:[#allocation2 + $0x40] sm:$0xff] (!%p850_p12), %v1066_v16  ;;  %354 = vst [vmem:[#allocation2 + $0x48] sm:$0xff] (!%p850_p12), %v1066_v16 }
  0x34   : > { %355 = vst [vmem:[#allocation2 + $0x50] sm:$0xff] (!%p850_p12), %v1066_v16  ;;  %356 = vst [vmem:[#allocation2 + $0x58] sm:$0xff] (!%p850_p12), %v1066_v16 }
  0x35   : > { %357 = vst [vmem:[#allocation2 + $0x60] sm:$0xff] (!%p850_p12), %v1066_v16  ;;  %358 = vst [vmem:[#allocation2 + $0x68] sm:$0xff] (!%p850_p12), %v1066_v16 }
  0x36   : > { %359 = vst [vmem:[#allocation2 + $0x70] sm:$0xff] (!%p850_p12), %v1066_v16  ;;  %360 = vst [vmem:[#allocation2 + $0x78] sm:$0xff] (!%p850_p12), %v1066_v16 }
  0x37 PF: > { %v994_v17 = vld [vmem:[%s1178_s29] sm:$0xff]   ;;  %v995_v18 = vld [vmem:[%s1178_s29 + $0x8] sm:$0xff]   ;;  %v996_v19 = vld [vmem:[%s1178_s29 + $0x10] sm:$0xff]   ;;  %p867_p13 = scmp.ne.s32.totalorder %s1048_s17, 1 }
  0x38   : > { %889 = vmatprep.subr.bf16.mxu0 %v994_v17  ;;  %921 = vmatprep.subr.bf16.mxu1 %v994_v17  ;;  %v997_v20 = vld [vmem:[%s1178_s29 + $0x18] sm:$0xff]   ;;  %v1002_v21 = vld [vmem:[%s1185_s15] sm:$0xff]   ;;  %v999_v24 = vld [vmem:[%s1178_s29 + $0x28] sm:$0xff]  }
  0x39   : > { %890 = vmatpush3.bf16.msra.mxu0 %v994_v17  ;;  %929 = vmatpush3.bf16.msra.mxu1 %v994_v17  ;;  %v1003_v22 = vld [vmem:[%s1185_s15 + $0x20] sm:$0xff]   ;;  %v1000_v25 = vld [vmem:[%s1178_s29 + $0x30] sm:$0xff]   ;;  %v1001_v26 = vld [vmem:[%s1178_s29 + $0x38] sm:$0xff]  }
  0x3a   : > { %891 = vmatprep.subr.bf16.mxu0 %v995_v18  ;;  %922 = vmatprep.subr.bf16.mxu1 %v995_v18  ;;  %v998_v23 = vld [vmem:[%s1178_s29 + $0x20] sm:$0xff]   ;;  %v1004_v27 = vld [vmem:[%s1185_s15 + $0x8] sm:$0xff]   ;;  %v1006_v29 = vld [vmem:[%s1185_s15 + $0x10] sm:$0xff]  }
  0x3b   : > { %905 = vmatprep.mubr.bf16.mxu0 %v1002_v21  ;;  %913 = vmatprep.mubr.bf16.mxu1 %v1003_v22  ;;  %v1005_v28 = vld [vmem:[%s1185_s15 + $0x28] sm:$0xff]   ;;  %v1007_v30 = vld [vmem:[%s1185_s15 + $0x30] sm:$0xff]   ;;  %v1008_v31 = vld [vmem:[%s1185_s15 + $0x18] sm:$0xff]  }
  0x3c   : > { %v1009_v32 = vld [vmem:[%s1185_s15 + $0x38] sm:$0xff]   ;;  %v363_v33 = vld [vmem:[#allocation2 + $0x10] sm:$0xff]  ;;  %v361_v35 = vld [vmem:[#allocation2] sm:$0xff] }
  0x3d   : > { %892 = vmatpush3.bf16.msra.mxu0 %v995_v18  ;;  %930 = vmatpush3.bf16.msra.mxu1 %v995_v18  ;;  %v371_v34 = vld [vmem:[#allocation2 + $0x50] sm:$0xff]  ;;  %v369_v36 = vld [vmem:[#allocation2 + $0x40] sm:$0xff]  ;;  %v364_v39 = vld [vmem:[#allocation2 + $0x18] sm:$0xff] }
  0x3e   : > { %893 = vmatprep.subr.bf16.mxu0 %v996_v19  ;;  %923 = vmatprep.subr.bf16.mxu1 %v996_v19  ;;  %v372_v40 = vld [vmem:[#allocation2 + $0x58] sm:$0xff]  ;;  %v362_v45 = vld [vmem:[#allocation2 + $0x8] sm:$0xff]  ;;  %v367_v57 = vld [vmem:[#allocation2 + $0x30] sm:$0xff] }
  0x3f   : > { %v370_v46 = vld [vmem:[#allocation2 + $0x48] sm:$0xff]  ;;  %v375_v58 = vld [vmem:[#allocation2 + $0x70] sm:$0xff]  ;;  %v365_v59 = vld [vmem:[#allocation2 + $0x20] sm:$0xff] }
  0x40   : > { %v373_v60 = vld [vmem:[#allocation2 + $0x60] sm:$0xff]  ;;  %v368_v63 = vld [vmem:[#allocation2 + $0x38] sm:$0xff]  ;;  %v366_v5 = vld [vmem:[#allocation2 + $0x28] sm:$0xff] }
  0x41   : > { %894 = vmatpush3.bf16.msra.mxu0 %v996_v19  ;;  %931 = vmatpush3.bf16.msra.mxu1 %v996_v19  ;;  %v376_v0 = vld [vmem:[#allocation2 + $0x78] sm:$0xff]  ;;  %v374_v6 = vld [vmem:[#allocation2 + $0x68] sm:$0xff]  ;;  %v1208_v18 = vld [vmem:[%s1287_s2] ss:$0 sm:$0xff] (!%p867_p13) }
  0x42   : > { %895 = vmatprep.subr.bf16.mxu0 %v997_v20  ;;  %924 = vmatprep.subr.bf16.mxu1 %v997_v20  ;;  %v1213_v19 = vld [vmem:[%s1288_s3] ss:$0 sm:$0xff] (!%p867_p13) }
  0x45   : > { %896 = vmatpush3.bf16.msra.mxu0 %v997_v20  ;;  %932 = vmatpush3.bf16.msra.mxu1 %v997_v20 }
  0x46   : > { %897 = vmatprep.subr.bf16.mxu0 %v998_v23  ;;  %925 = vmatprep.subr.bf16.mxu1 %v998_v23 }
  0x49   : > { %898 = vmatpush3.bf16.msra.mxu0 %v998_v23  ;;  %933 = vmatpush3.bf16.msra.mxu1 %v998_v23 }
  0x4a   : > { %899 = vmatprep.subr.bf16.mxu0 %v999_v24  ;;  %926 = vmatprep.subr.bf16.mxu1 %v999_v24 }
  0x4d   : > { %900 = vmatpush3.bf16.msra.mxu0 %v999_v24  ;;  %934 = vmatpush3.bf16.msra.mxu1 %v999_v24 }
  0x4e   : > { %901 = vmatprep.subr.bf16.mxu0 %v1000_v25  ;;  %927 = vmatprep.subr.bf16.mxu1 %v1000_v25 }
  0x51   : > { %902 = vmatpush3.bf16.msra.mxu0 %v1000_v25  ;;  %935 = vmatpush3.bf16.msra.mxu1 %v1000_v25 }
  0x52   : > { %903 = vmatprep.subr.bf16.mxu0 %v1001_v26  ;;  %928 = vmatprep.subr.bf16.mxu1 %v1001_v26 }
  0x55   : > { %904 = vmatpush3.bf16.msra.mxu0 %v1001_v26  ;;  %936 = vmatpush3.bf16.msra.mxu1 %v1001_v26 }
  0x58   : > { %906 = vmatmul.mubr.bf16.vlgmr.msra.gmra.mrb[0].mxu0 %v1004_v27  ;;  %914 = vmatmul.mubr.bf16.vlgmr.msra.gmra.mrb[0].mxu1 %v1005_v28 }
  0x59   : > { %909 = vmatprep.mubr.bf16.mxu0 %v1006_v29  ;;  %917 = vmatprep.mubr.bf16.mxu1 %v1007_v30 }
  0x60   : > { %910 = vmatmul.mubr.bf16.gmra.mrb[4].mxu0 %v1008_v31  ;;  %918 = vmatmul.mubr.bf16.gmra.mrb[4].mxu1 %v1009_v32 }
 0x12b   : > { %v907_v37 = vpop.f32.mrb[0].mxu0  ;;  %v915_v38 = vpop.f32.mrb[0].mxu1 }
 0x12c   : > { %v604_v41 = vadd.f32 %v907_v37, %v363_v33  ;;  %v612_v42 = vadd.f32 %v915_v38, %v371_v34  ;;  %v539_v43 = vpop.f32.mrb[1].mxu0  ;;  %v571_v44 = vpop.f32.mrb[1].mxu1 }
 0x12d   : > { %v602_v47 = vadd.f32 %v539_v43, %v361_v35  ;;  %v610_v48 = vadd.f32 %v571_v44, %v369_v36  ;;  %v908_v49 = vpop.f32.mrb[2].mxu0  ;;  %v916_v50 = vpop.f32.mrb[2].mxu1 }
 0x12e   : > { %620 = vst [vmem:[#allocation2 + $0x10] sm:$0xff] %v604_v41  ;;  %628 = vst [vmem:[#allocation2 + $0x50] sm:$0xff] %v612_v42  ;;  %v605_v51 = vadd.f32 %v908_v49, %v364_v39  ;;  %v613_v52 = vadd.f32 %v916_v50, %v372_v40  ;;  %v542_v53 = vpop.f32.mrb[3].mxu0  ;;  %v574_v54 = vpop.f32.mrb[3].mxu1 }
 0x12f   : > { %618 = vst [vmem:[#allocation2] sm:$0xff] %v602_v47  ;;  %626 = vst [vmem:[#allocation2 + $0x40] sm:$0xff] %v610_v48  ;;  %v603_v55 = vadd.f32 %v542_v53, %v362_v45  ;;  %v611_v56 = vadd.f32 %v574_v54, %v370_v46 }
 0x130   : > { %621 = vst [vmem:[#allocation2 + $0x18] sm:$0xff] %v605_v51  ;;  %629 = vst [vmem:[#allocation2 + $0x58] sm:$0xff] %v613_v52 }
 0x131   : > { %619 = vst [vmem:[#allocation2 + $0x8] sm:$0xff] %v603_v55  ;;  %627 = vst [vmem:[#allocation2 + $0x48] sm:$0xff] %v611_v56 }
 0x133   : > { %v911_v61 = vpop.f32.mrb[4].mxu0  ;;  %v919_v62 = vpop.f32.mrb[4].mxu1  ;;  %637 = sbr.rel (%p867_p13) target bundleno = 332 (0x14c), region = 85 }
 0x134   : > { %v608_v1 = vadd.f32 %v911_v61, %v367_v57  ;;  %v616_v2 = vadd.f32 %v919_v62, %v375_v58  ;;  %v555_v3 = vpop.f32.mrb[5].mxu0  ;;  %v587_v4 = vpop.f32.mrb[5].mxu1 }
 0x135   : > { %v606_v7 = vadd.f32 %v555_v3, %v365_v59  ;;  %v614_v8 = vadd.f32 %v587_v4, %v373_v60  ;;  %v912_v9 = vpop.f32.mrb[6].mxu0  ;;  %v920_v10 = vpop.f32.mrb[6].mxu1  ;;  %v640_v22 = vld [vmem:[#allocation2 + $0x10] sm:$0xff] (!%p867_p13) }
 0x136   : > { %624 = vst [vmem:[#allocation2 + $0x30] sm:$0xff] %v608_v1  ;;  %632 = vst [vmem:[#allocation2 + $0x70] sm:$0xff] %v616_v2  ;;  %v609_v11 = vadd.f32 %v912_v9, %v368_v63  ;;  %v617_v12 = vadd.f32 %v920_v10, %v376_v0  ;;  %v558_v13 = vpop.f32.mrb[7].mxu0  ;;  %v590_v14 = vpop.f32.mrb[7].mxu1  ;;  %v638_v17 = vld [vmem:[#allocation2] sm:$0xff] (!%p867_p13)  ;;  %v663_v25 = vadd.f32 (!%p867_p13), %v1208_v18, %v640_v22  ;;  %v648_v40 = vld [vmem:[#allocation2 + $0x50] sm:$0xff] (!%p867_p13) }
 0x137   : > { %622 = vst [vmem:[#allocation2 + $0x20] sm:$0xff] %v606_v7  ;;  %630 = vst [vmem:[#allocation2 + $0x60] sm:$0xff] %v614_v8  ;;  %v607_v15 = vadd.f32 %v558_v13, %v366_v5  ;;  %v615_v16 = vadd.f32 %v590_v14, %v374_v6  ;;  %v661_v20 = vadd.f32 (!%p867_p13), %v1208_v18, %v638_v17  ;;  %v641_v23 = vld [vmem:[#allocation2 + $0x18] sm:$0xff] (!%p867_p13)  ;;  %v646_v38 = vld [vmem:[#allocation2 + $0x40] sm:$0xff] (!%p867_p13) }
 0x138   : > { %625 = vst [vmem:[#allocation2 + $0x38] sm:$0xff] %v609_v11  ;;  %633 = vst [vmem:[#allocation2 + $0x78] sm:$0xff] %v617_v12  ;;  %v639_v21 = vld [vmem:[#allocation2 + $0x8] sm:$0xff] (!%p867_p13)  ;;  %v664_v26 = vadd.f32 (!%p867_p13), %v1208_v18, %v641_v23  ;;  %vm679_vm2 = vcmp.gt.f32.partialorder (!%p867_p13), %v663_v25, 0.0  ;;  %v702_v33 = vmul.f32 (!%p867_p13), %v1213_v19, %v663_v25  ;;  %v669_v49 = vadd.f32 (!%p867_p13), %v1208_v18, %v646_v38  ;;  %v649_v54 = vld [vmem:[#allocation2 + $0x58] sm:$0xff] (!%p867_p13) }
 0x139   : > { %623 = vst [vmem:[#allocation2 + $0x28] sm:$0xff] %v607_v15  ;;  %631 = vst [vmem:[#allocation2 + $0x68] sm:$0xff] %v615_v16  ;;  %v662_v24 = vadd.f32 (!%p867_p13), %v1208_v18, %v639_v21  ;;  %vm677_vm0 = vcmp.gt.f32.partialorder (!%p867_p13), %v661_v20, 0.0  ;;  %v700_v29 = vmul.f32 (!%p867_p13), %v1213_v19, %v661_v20  ;;  %v647_v39 = vld [vmem:[#allocation2 + $0x48] sm:$0xff] (!%p867_p13)  ;;  %v671_v51 = vadd.f32 (!%p867_p13), %v1208_v18, %v648_v40 }
 0x13a   : > { %vm680_vm3 = vcmp.gt.f32.partialorder %v664_v26, 0.0  ;;  %v703_v37 = vmul.f32 %v1213_v19, %v664_v26  ;;  %v718_v42 = vsel %vm679_vm2, %v663_v25, %v702_v33  ;;  %v670_v50 = vadd.f32 %v1208_v18, %v647_v39 }
 0x13b   : > { %vm678_vm1 = vcmp.gt.f32.partialorder %v662_v24, 0.0  ;;  %v701_v32 = vmul.f32 %v1213_v19, %v662_v24  ;;  %v716_v36 = vsel %vm677_vm0, %v661_v20, %v700_v29  ;;  %734 = vst [vmem:[%s1183_s7 + $0x10] sm:$0xff] %v718_v42  ;;  %vm685_vm8 = vcmp.gt.f32.partialorder %v669_v49, 0.0 }
 0x13c   : > { %732 = vst [vmem:[%s1183_s7] sm:$0xff] %v716_v36  ;;  %v719_v44 = vsel %vm680_vm3, %v664_v26, %v703_v37  ;;  %v708_v57 = vmul.f32 %v1213_v19, %v669_v49  ;;  %vm686_vm9 = vcmp.gt.f32.partialorder %v670_v50, 0.0  ;;  %v709_v61 = vmul.f32 %v1213_v19, %v670_v50 }
 0x13d   : > { %v644_v34 = vld [vmem:[#allocation2 + $0x30] sm:$0xff]  ;;  %v717_v41 = vsel %vm678_vm1, %v662_v24, %v701_v32  ;;  %735 = vst [vmem:[%s1183_s7 + $0x18] sm:$0xff] %v719_v44  ;;  %vm687_vm10 = vcmp.gt.f32.partialorder %v671_v51, 0.0  ;;  %v710_v62 = vmul.f32 %v1213_v19, %v671_v51  ;;  %v672_v1 = vadd.f32 %v1208_v18, %v649_v54 }
 0x13e   : > { %v642_v27 = vld [vmem:[#allocation2 + $0x20] sm:$0xff]  ;;  %733 = vst [vmem:[%s1183_s7 + $0x8] sm:$0xff] %v717_v41  ;;  %v667_v46 = vadd.f32 %v1208_v18, %v644_v34  ;;  %v652_v59 = vld [vmem:[#allocation2 + $0x70] sm:$0xff]  ;;  %v724_v0 = vsel %vm685_vm8, %v669_v49, %v708_v57  ;;  %v725_v3 = vsel %vm686_vm9, %v670_v50, %v709_v61 }
 0x13f   : > { %v665_v30 = vadd.f32 %v1208_v18, %v642_v27  ;;  %v645_v35 = vld [vmem:[#allocation2 + $0x38] sm:$0xff]  ;;  %v650_v55 = vld [vmem:[#allocation2 + $0x60] sm:$0xff]  ;;  %740 = vst [vmem:[%s1183_s7 + $0x40] sm:$0xff] %v724_v0  ;;  %v726_v4 = vsel %vm687_vm10, %v671_v51, %v710_v62  ;;  %v675_v6 = vadd.f32 %v1208_v18, %v652_v59  ;;  %741 = vst [vmem:[%s1183_s7 + $0x48] sm:$0xff] %v725_v3  ;;  %vm688_vm11 = vcmp.gt.f32.partialorder %v672_v1, 0.0 }
 0x140   : > { %v643_v28 = vld [vmem:[#allocation2 + $0x28] sm:$0xff]  ;;  %v668_v47 = vadd.f32 %v1208_v18, %v645_v35  ;;  %vm683_vm6 = vcmp.gt.f32.partialorder %v667_v46, 0.0  ;;  %v706_v53 = vmul.f32 %v1213_v19, %v667_v46  ;;  %v673_v2 = vadd.f32 %v1208_v18, %v650_v55  ;;  %v653_v7 = vld [vmem:[#allocation2 + $0x78] sm:$0xff]  ;;  %742 = vst [vmem:[%s1183_s7 + $0x50] sm:$0xff] %v726_v4 }
 0x141   : > { %v666_v31 = vadd.f32 %v1208_v18, %v643_v28  ;;  %vm681_vm4 = vcmp.gt.f32.partialorder %v665_v30, 0.0  ;;  %v704_v43 = vmul.f32 %v1213_v19, %v665_v30  ;;  %v651_v58 = vld [vmem:[#allocation2 + $0x68] sm:$0xff]  ;;  %v711_v8 = vmul.f32 %v1213_v19, %v672_v1 }
 0x142   : > { %vm684_vm7 = vcmp.gt.f32.partialorder %v668_v47, 0.0  ;;  %v707_v56 = vmul.f32 %v1213_v19, %v668_v47  ;;  %v722_v60 = vsel %vm683_vm6, %v667_v46, %v706_v53  ;;  %v674_v5 = vadd.f32 %v1208_v18, %v651_v58 }
 0x143   : > { %vm682_vm5 = vcmp.gt.f32.partialorder %v666_v31, 0.0  ;;  %v705_v45 = vmul.f32 %v1213_v19, %v666_v31  ;;  %v720_v48 = vsel %vm681_vm4, %v665_v30, %v704_v43  ;;  %738 = vst [vmem:[%s1183_s7 + $0x30] sm:$0xff] %v722_v60  ;;  %vm689_vm12 = vcmp.gt.f32.partialorder %v673_v2, 0.0 }
 0x144   : > { %736 = vst [vmem:[%s1183_s7 + $0x20] sm:$0xff] %v720_v48  ;;  %v723_v63 = vsel %vm684_vm7, %v668_v47, %v707_v56  ;;  %v712_v9 = vmul.f32 %v1213_v19, %v673_v2  ;;  %vm690_vm13 = vcmp.gt.f32.partialorder %v674_v5, 0.0  ;;  %v713_v10 = vmul.f32 %v1213_v19, %v674_v5 }
 0x145   : > { %v721_v52 = vsel %vm682_vm5, %v666_v31, %v705_v45  ;;  %739 = vst [vmem:[%s1183_s7 + $0x38] sm:$0xff] %v723_v63  ;;  %vm691_vm14 = vcmp.gt.f32.partialorder %v675_v6, 0.0  ;;  %v714_v11 = vmul.f32 %v1213_v19, %v675_v6  ;;  %v727_v12 = vsel %vm688_vm11, %v672_v1, %v711_v8 }
 0x146   : > { %737 = vst [vmem:[%s1183_s7 + $0x28] sm:$0xff] %v721_v52  ;;  %v728_v13 = vsel %vm689_vm12, %v673_v2, %v712_v9  ;;  %v676_v14 = vadd.f32 %v1208_v18, %v653_v7  ;;  %743 = vst [vmem:[%s1183_s7 + $0x58] sm:$0xff] %v727_v12  ;;  %v729_v15 = vsel %vm690_vm13, %v674_v5, %v713_v10 }
 0x147   : > { %744 = vst [vmem:[%s1183_s7 + $0x60] sm:$0xff] %v728_v13  ;;  %v730_v16 = vsel %vm691_vm14, %v675_v6, %v714_v11  ;;  %745 = vst [vmem:[%s1183_s7 + $0x68] sm:$0xff] %v729_v15 }
 0x148   : > { %746 = vst [vmem:[%s1183_s7 + $0x70] sm:$0xff] %v730_v16  ;;  %vm692_vm15 = vcmp.gt.f32.partialorder %v676_v14, 0.0  ;;  %v715_v17 = vmul.f32 %v1213_v19, %v676_v14 }
 0x14a   : > { %v731_v20 = vsel %vm692_vm15, %v676_v14, %v715_v17 }
 0x14b   : > { %747 = vst [vmem:[%s1183_s7 + $0x78] sm:$0xff] %v731_v20 }
 0x14c PF: > { %s14_s21 = sadd.s32 1, %s1064_s21   ;;  %s1290_s15 = smov %s1044_s16 }
 0x14d   : > { %p11_p0 = scmp.ge.s32.totalorder %s14_s21, 6   ;;  %s1291_s16 = smov %s1143_s28 }
 0x14e   : > { %s1292_s17 = smov %s1056_s19  ;;  %s1293_s18 = smov %s1060_s20 }
 0x14f   : > { %s1294_s19 = smov %s1297_s22  ;;  %s1295_s20 = smov %s1301_s23 }
 0x150   :  { %13 = sbr.rel (!%p11_p0) target bundleno = 4 (0x4), region = 123 }

</bundles_post_ra>
